<compile_context>
chip_gen: v7x
topology: tpu7x:2x2x1
jax: 0.10.0
libtpu: 0.0.40
codegen_flags: <defaults>
</compile_context>

<pallas_src>
import functools

import jax
import jax.numpy as jnp
from jax.experimental import pallas as pl
from jax.experimental.pallas import tpu as pltpu


LANES = 128                 # vreg lane width
NUM_SHARDS = 2              # leading "parallel" grid axis (v7x megacore); size-gated below
DEFAULT_BLOCK_ROWS = 1024   # (1024,128) f32 tile = 512 KiB/input; well inside scoped VMEM


def _combined_loss_kernel(x_ref, t_ref,
                          bce_out, inter_out, union_out,
                          acc_bce, acc_inter, acc_union):
    """Grid = (shards, nblocks); axis 0 is 'parallel', axis 1 is the reduction."""
    b = pl.program_id(1)

    @pl.when(b == 0)
    def _init():
        acc_bce[...] = jnp.zeros_like(acc_bce)
        acc_inter[...] = jnp.zeros_like(acc_inter)
        acc_union[...] = jnp.zeros_like(acc_union)

    x = x_ref[...].astype(jnp.float32)
    t = t_ref[...].astype(jnp.float32)

    # Numerically-stable BCE-with-logits and sigmoid sharing e = exp(-|x|):
    #   bce        = max(x, 0) - x*t + log1p(e)
    #   sigmoid(x) = (x >= 0 ? 1 : e) / (1 + e)
    e = jnp.exp(-jnp.abs(x))
    bce = jnp.maximum(x, 0.0) - x * t + jnp.log1p(e)
    d = 1.0 + e
    r = pl.reciprocal(d, approx=True)
    r = r * (2.0 - d * r)                    # one Newton step -> ~f32 accuracy
    p = jnp.where(x >= 0.0, 1.0, e) * r      # sigmoid(x)

    # Fold (br,128) -> (8,128): bitcast reshape + vreg-wise adds only (no XLU),
    # then a single (8,128) RMW per accumulator (unloads the scarce vst slot).
    def fold(v):
        return jnp.sum(v.reshape(-1, 8, LANES), axis=0)

    acc_bce[...] += fold(bce)
    acc_inter[...] += fold(p * t)
    acc_union[...] += fold(p + t)

    @pl.when(b == pl.num_programs(1) - 1)
    def _finalize():
        bce_out[...] = acc_bce[...]
        inter_out[...] = acc_inter[...]
        union_out[...] = acc_union[...]


def _partial_sums_jax(x, t):
    """Plain-JAX partial sums (bce_sum, inter_sum, union_sum) for the tiny tail."""
    x = x.astype(jnp.float32)
    t = t.astype(jnp.float32)
    e = jnp.exp(-jnp.abs(x))
    bce = jnp.maximum(x, 0.0) - x * t + jnp.log1p(e)
    p = jnp.where(x >= 0.0, 1.0, e) / (1.0 + e)
    return jnp.sum(bce), jnp.sum(p * t), jnp.sum(p + t)


@functools.partial(jax.jit, static_argnames=("block_rows",))
def combined_loss(inputs, targets, weights=None, smooth=1.0,
                  block_rows=DEFAULT_BLOCK_ROWS):
    """CombinedLoss([BCEWithLogitsLoss(), DiceLoss()], weights) forward pass."""
    assert inputs.shape == targets.shape
    if weights is None:
        weights = (0.5, 0.5)            # PyTorch default: 1/len(losses) each
    w_bce, w_dice = weights

    total = inputs.size
    x_flat = inputs.reshape(-1)         # free view of a contiguous NCHW tensor
    t_flat = targets.reshape(-1)

    # Row quantum keeps sublane packing clean for the narrowest streamed dtype
    # (f32 -> 8, bf16 -> 16, int8/bool -> 32 rows).
    min_item = min(jnp.dtype(inputs.dtype).itemsize,
                   jnp.dtype(targets.dtype).itemsize)
    row_q = max(8, 32 // int(min_item))

    rows_full = total // LANES          # complete 128-lane rows available

    bce_sum = jnp.float32(0.0)
    inter_sum = jnp.float32(0.0)
    union_sum = jnp.float32(0.0)
    main_total = 0

    if rows_full >= row_q:
        shards = NUM_SHARDS if rows_full >= NUM_SHARDS * row_q else 1
        rows_per_shard = rows_full // shards
        br = max(row_q, (min(block_rows, rows_per_shard) // row_q) * row_q)
        nblocks = rows_per_shard // br
        main_rows = shards * nblocks * br
        main_total = main_rows * LANES

        # Kernel consumes the largest block-aligned prefix (no padding, no
        # in-kernel masking).  The aligned common case passes the array through
        # untouched; only ragged sizes slice a prefix.
        if main_total == total:
            x_main, t_main = x_flat, t_flat
        else:
            x_main, t_main = x_flat[:main_total], t_flat[:main_total]
        x2 = x_main.reshape(main_rows, LANES)
        t2 = t_main.reshape(main_rows, LANES)

        # NOTE: if a profile shows exposed DMA with bf16/int8 inputs, add
        # pipeline_mode=pl.Buffered(3) to the two input BlockSpecs.
        out_bce, out_inter, out_union = pl.pallas_call(
            _combined_loss_kernel,
            grid=(shards, nblocks),
            in_specs=[
                pl.BlockSpec((br, LANES), lambda s, b: (s * nblocks + b, 0)),
                pl.BlockSpec((br, LANES), lambda s, b: (s * nblocks + b, 0)),
            ],
            out_shape=(
                jax.ShapeDtypeStruct((shards * 8, LANES), jnp.float32),
                jax.ShapeDtypeStruct((shards * 8, LANES), jnp.float32),
                jax.ShapeDtypeStruct((shards * 8, LANES), jnp.float32),
            ),
            out_specs=(
                pl.BlockSpec((8, LANES), lambda s, b: (s, 0)),
                pl.BlockSpec((8, LANES), lambda s, b: (s, 0)),
                pl.BlockSpec((8, LANES), lambda s, b: (s, 0)),
            ),
            scratch_shapes=[pltpu.VMEM((8, LANES), jnp.float32)] * 3,
            compiler_params=pltpu.CompilerParams(
                dimension_semantics=("parallel", "arbitrary")),
        )(x2, t2)

        bce_sum = jnp.sum(out_bce)
        inter_sum = jnp.sum(out_inter)
        union_sum = jnp.sum(out_union)

    if main_total < total:
        # Ragged tail (< one block per shard): plain JAX, negligible traffic.
        tb, ti, tu = _partial_sums_jax(x_flat[main_total:], t_flat[main_total:])
        bce_sum = bce_sum + tb
        inter_sum = inter_sum + ti
        union_sum = union_sum + tu

    # Tiny final combine in plain JAX (partials -> scalar loss).
    bce_mean = bce_sum / total
    dice = 1.0 - (2.0 * inter_sum + smooth) / (union_sum + smooth)
    return w_bce * bce_mean + w_dice * dice


def _reference_combined_loss(inputs, targets, weights=None, smooth=1.0):
    if weights is None:
        weights = (0.5, 0.5)
    x = inputs.reshape(-1).astype(jnp.float32)
    t = targets.reshape(-1).astype(jnp.float32)
    bce = jnp.mean(jnp.maximum(x, 0.0) - x * t + jnp.log1p(jnp.exp(-jnp.abs(x))))
    p = jax.nn.sigmoid(x)
    dice = 1.0 - (2.0 * jnp.sum(p * t) + smooth) / (jnp.sum(p) + jnp.sum(t) + smooth)
    return weights[0] * bce + weights[1] * dice


if __name__ == "__main__":
    key = jax.random.PRNGKey(0)

    # (shape, dtypes, kwargs, tolerance)
    cases = [
        ((2, 4, 16, 16), (jnp.float32, jnp.float32), {}, 1e-5),   # canonical UNet head, exact fit
        ((2, 3, 17, 13), (jnp.float32, jnp.float32), {}, 1e-5),   # odd size -> prefix + JAX tail
        ((2, 4, 64, 64), (jnp.float32, jnp.float32), {"block_rows": 64}, 1e-5),  # multi-block reduction
        ((2, 4, 64, 64), (jnp.bfloat16, jnp.int8), {}, 1e-4),     # narrow-dtype streaming path
    ]
    for i, (shape, (xdt, tdt), kwargs, tol) in enumerate(cases):
        k1, k2 = jax.random.split(jax.random.fold_in(key, i))
        logits = jax.random.normal(k1, shape, dtype=jnp.float32).astype(xdt)
        masks = (jax.random.uniform(k2, shape) > 0.5).astype(tdt)

        loss = jax.block_until_ready(combined_loss(logits, masks, **kwargs))
        ref = _reference_combined_loss(logits, masks)
        assert jnp.allclose(loss, ref, rtol=tol, atol=tol), (shape, loss, ref)

    print("KERNEL_OK")
</pallas_src>

<mosaic_0001>
module attributes {stable_mosaic.version = 11 : i64} {
  func.func @_combined_loss_kernel(%arg0: i32, %arg1: i32, %arg2: memref<8x128xf32, #tpu.memory_space<vmem>>, %arg3: memref<8x128xf32, #tpu.memory_space<vmem>>, %arg4: memref<8x128xf32, #tpu.memory_space<vmem>>, %arg5: memref<8x128xf32, #tpu.memory_space<vmem>>, %arg6: memref<8x128xf32, #tpu.memory_space<vmem>>, %arg7: memref<8x128xf32, #tpu.memory_space<vmem>>, %arg8: memref<8x128xf32, #tpu.memory_space<vmem>>, %arg9: memref<8x128xf32, #tpu.memory_space<vmem>>) attributes {dimension_semantics = [#tpu.dimension_semantics<parallel>, #tpu.dimension_semantics<arbitrary>], iteration_bounds = array<i64: 2, 1>, scalar_prefetch = 0 : i64, scratch_operands = 3 : i64, tpu.core_type = #tpu.core_type<tc>, window_params = [{transform_indices = @transform_0, window_bounds = array<i64: 8, 128>}, {transform_indices = @transform_1, window_bounds = array<i64: 8, 128>}, {transform_indices = @transform_2, window_bounds = array<i64: 8, 128>}, {transform_indices = @transform_3, window_bounds = array<i64: 8, 128>}, {transform_indices = @transform_4, window_bounds = array<i64: 8, 128>}]} {
    %c0_i32 = arith.constant 0 : i32
    %0 = arith.cmpi eq, %arg1, %c0_i32 : i32
    %1 = arith.extui %0 : i1 to i32
    %c0_i32_0 = arith.constant 0 : i32
    %2 = arith.cmpi ne, %1, %c0_i32_0 : i32
    scf.if %2 {
      %cst_26 = arith.constant 0.000000e+00 : f32
      %47 = vector.broadcast %cst_26 : f32 to vector<8x128xf32>
      %c0_27 = arith.constant 0 : index
      %c0_28 = arith.constant 0 : index
      %48 = vector.load %arg7[%c0_27, %c0_28] : memref<8x128xf32, #tpu.memory_space<vmem>>, vector<8x128xf32>
      tpu.vector_store %arg7[%c0_27, %c0_28], %47 {strides = array<i32>} : memref<8x128xf32, #tpu.memory_space<vmem>>, vector<8x128xf32>,
      %cst_29 = arith.constant 0.000000e+00 : f32
      %49 = vector.broadcast %cst_29 : f32 to vector<8x128xf32>
      %c0_30 = arith.constant 0 : index
      %c0_31 = arith.constant 0 : index
      %50 = vector.load %arg8[%c0_30, %c0_31] : memref<8x128xf32, #tpu.memory_space<vmem>>, vector<8x128xf32>
      tpu.vector_store %arg8[%c0_30, %c0_31], %49 {strides = array<i32>} : memref<8x128xf32, #tpu.memory_space<vmem>>, vector<8x128xf32>,
      %cst_32 = arith.constant 0.000000e+00 : f32
      %51 = vector.broadcast %cst_32 : f32 to vector<8x128xf32>
      %c0_33 = arith.constant 0 : index
      %c0_34 = arith.constant 0 : index
      %52 = vector.load %arg9[%c0_33, %c0_34] : memref<8x128xf32, #tpu.memory_space<vmem>>, vector<8x128xf32>
      tpu.vector_store %arg9[%c0_33, %c0_34], %51 {strides = array<i32>} : memref<8x128xf32, #tpu.memory_space<vmem>>, vector<8x128xf32>,
    } else {
    }
    %c0 = arith.constant 0 : index
    %c0_1 = arith.constant 0 : index
    %3 = vector.load %arg2[%c0, %c0_1] : memref<8x128xf32, #tpu.memory_space<vmem>>, vector<8x128xf32>
    %c0_2 = arith.constant 0 : index
    %c0_3 = arith.constant 0 : index
    %4 = vector.load %arg3[%c0_2, %c0_3] : memref<8x128xf32, #tpu.memory_space<vmem>>, vector<8x128xf32>
    %5 = math.absf %3 : vector<8x128xf32>
    %cst = arith.constant 0.000000e+00 : f32
    %6 = vector.broadcast %cst : f32 to vector<8x128xf32>
    %7 = arith.subf %6, %5 : vector<8x128xf32>
    %8 = math.exp %7 : vector<8x128xf32>
    %cst_4 = arith.constant 0.000000e+00 : f32
    %9 = vector.broadcast %cst_4 : f32 to vector<8x128xf32>
    %10 = arith.maximumf %3, %9 : vector<8x128xf32>
    %11 = arith.mulf %3, %4 : vector<8x128xf32>
    %12 = arith.subf %10, %11 : vector<8x128xf32>
    %13 = math.log1p %8 : vector<8x128xf32>
    %14 = arith.addf %12, %13 : vector<8x128xf32>
    %cst_5 = arith.constant 1.000000e+00 : f32
    %15 = vector.broadcast %cst_5 : f32 to vector<8x128xf32>
    %16 = arith.addf %15, %8 : vector<8x128xf32>
    %17 = tpu.reciprocal %16 {approx = true} : vector<8x128xf32> -> vector<8x128xf32>
    %18 = arith.mulf %16, %17 : vector<8x128xf32>
    %cst_6 = arith.constant 2.000000e+00 : f32
    %19 = vector.broadcast %cst_6 : f32 to vector<8x128xf32>
    %20 = arith.subf %19, %18 : vector<8x128xf32>
    %21 = arith.mulf %17, %20 : vector<8x128xf32>
    %cst_7 = arith.constant 0.000000e+00 : f32
    %22 = vector.broadcast %cst_7 : f32 to vector<8x128xf32>
    %23 = arith.cmpf oge, %3, %22 : vector<8x128xf32>
    %cst_8 = arith.constant 1.000000e+00 : f32
    %24 = vector.broadcast %cst_8 : f32 to vector<8x128xf32>
    %25 = arith.select %23, %24, %8 : vector<8x128xi1>, vector<8x128xf32>
    %26 = arith.mulf %25, %21 : vector<8x128xf32>
    %c0_9 = arith.constant 0 : index
    %c0_10 = arith.constant 0 : index
    %27 = vector.load %arg7[%c0_9, %c0_10] : memref<8x128xf32, #tpu.memory_space<vmem>>, vector<8x128xf32>
    %28 = vector.shape_cast %14 : vector<8x128xf32> to vector<1x8x128xf32>
    %cst_11 = arith.constant dense<0.000000e+00> : vector<8x128xf32>
    %29 = vector.multi_reduction <add>, %28, %cst_11 [0] : vector<1x8x128xf32> to vector<8x128xf32>
    %30 = arith.addf %27, %29 : vector<8x128xf32>
    %c0_12 = arith.constant 0 : index
    %c0_13 = arith.constant 0 : index
    %31 = vector.load %arg7[%c0_12, %c0_13] : memref<8x128xf32, #tpu.memory_space<vmem>>, vector<8x128xf32>
    tpu.vector_store %arg7[%c0_12, %c0_13], %30 {strides = array<i32>} : memref<8x128xf32, #tpu.memory_space<vmem>>, vector<8x128xf32>,
    %c0_14 = arith.constant 0 : index
    %c0_15 = arith.constant 0 : index
    %32 = vector.load %arg8[%c0_14, %c0_15] : memref<8x128xf32, #tpu.memory_space<vmem>>, vector<8x128xf32>
    %33 = arith.mulf %26, %4 : vector<8x128xf32>
    %34 = vector.shape_cast %33 : vector<8x128xf32> to vector<1x8x128xf32>
    %cst_16 = arith.constant dense<0.000000e+00> : vector<8x128xf32>
    %35 = vector.multi_reduction <add>, %34, %cst_16 [0] : vector<1x8x128xf32> to vector<8x128xf32>
    %36 = arith.addf %32, %35 : vector<8x128xf32>
    %c0_17 = arith.constant 0 : index
    %c0_18 = arith.constant 0 : index
    %37 = vector.load %arg8[%c0_17, %c0_18] : memref<8x128xf32, #tpu.memory_space<vmem>>, vector<8x128xf32>
    tpu.vector_store %arg8[%c0_17, %c0_18], %36 {strides = array<i32>} : memref<8x128xf32, #tpu.memory_space<vmem>>, vector<8x128xf32>,
    %c0_19 = arith.constant 0 : index
    %c0_20 = arith.constant 0 : index
    %38 = vector.load %arg9[%c0_19, %c0_20] : memref<8x128xf32, #tpu.memory_space<vmem>>, vector<8x128xf32>
    %39 = arith.addf %26, %4 : vector<8x128xf32>
    %40 = vector.shape_cast %39 : vector<8x128xf32> to vector<1x8x128xf32>
    %cst_21 = arith.constant dense<0.000000e+00> : vector<8x128xf32>
    %41 = vector.multi_reduction <add>, %40, %cst_21 [0] : vector<1x8x128xf32> to vector<8x128xf32>
    %42 = arith.addf %38, %41 : vector<8x128xf32>
    %c0_22 = arith.constant 0 : index
    %c0_23 = arith.constant 0 : index
    %43 = vector.load %arg9[%c0_22, %c0_23] : memref<8x128xf32, #tpu.memory_space<vmem>>, vector<8x128xf32>
    tpu.vector_store %arg9[%c0_22, %c0_23], %42 {strides = array<i32>} : memref<8x128xf32, #tpu.memory_space<vmem>>, vector<8x128xf32>,
    %c0_i32_24 = arith.constant 0 : i32
    %44 = arith.cmpi eq, %arg1, %c0_i32_24 : i32
    %45 = arith.extui %44 : i1 to i32
    %c0_i32_25 = arith.constant 0 : i32
    %46 = arith.cmpi ne, %45, %c0_i32_25 : i32
    scf.if %46 {
      %c0_26 = arith.constant 0 : index
      %c0_27 = arith.constant 0 : index
      %47 = vector.load %arg7[%c0_26, %c0_27] : memref<8x128xf32, #tpu.memory_space<vmem>>, vector<8x128xf32>
      %c0_28 = arith.constant 0 : index
      %c0_29 = arith.constant 0 : index
      %48 = vector.load %arg4[%c0_28, %c0_29] : memref<8x128xf32, #tpu.memory_space<vmem>>, vector<8x128xf32>
      tpu.vector_store %arg4[%c0_28, %c0_29], %47 {strides = array<i32>} : memref<8x128xf32, #tpu.memory_space<vmem>>, vector<8x128xf32>,
      %c0_30 = arith.constant 0 : index
      %c0_31 = arith.constant 0 : index
      %49 = vector.load %arg8[%c0_30, %c0_31] : memref<8x128xf32, #tpu.memory_space<vmem>>, vector<8x128xf32>
      %c0_32 = arith.constant 0 : index
      %c0_33 = arith.constant 0 : index
      %50 = vector.load %arg5[%c0_32, %c0_33] : memref<8x128xf32, #tpu.memory_space<vmem>>, vector<8x128xf32>
      tpu.vector_store %arg5[%c0_32, %c0_33], %49 {strides = array<i32>} : memref<8x128xf32, #tpu.memory_space<vmem>>, vector<8x128xf32>,
      %c0_34 = arith.constant 0 : index
      %c0_35 = arith.constant 0 : index
      %51 = vector.load %arg9[%c0_34, %c0_35] : memref<8x128xf32, #tpu.memory_space<vmem>>, vector<8x128xf32>
      %c0_36 = arith.constant 0 : index
      %c0_37 = arith.constant 0 : index
      %52 = vector.load %arg6[%c0_36, %c0_37] : memref<8x128xf32, #tpu.memory_space<vmem>>, vector<8x128xf32>
      tpu.vector_store %arg6[%c0_36, %c0_37], %51 {strides = array<i32>} : memref<8x128xf32, #tpu.memory_space<vmem>>, vector<8x128xf32>,
    } else {
    }
    return
  }
  func.func @transform_0(%arg0: i32, %arg1: i32) -> (i32, i32) {
    %c1_i32 = arith.constant 1 : i32
    %0 = arith.muli %arg0, %c1_i32 : i32
    %1 = arith.addi %0, %arg1 : i32
    %c0_i32 = arith.constant 0 : i32
    %c0_i32_0 = arith.constant 0 : i32
    return %1, %c0_i32 : i32, i32
  }
  func.func @transform_1(%arg0: i32, %arg1: i32) -> (i32, i32) {
    %c1_i32 = arith.constant 1 : i32
    %0 = arith.muli %arg0, %c1_i32 : i32
    %1 = arith.addi %0, %arg1 : i32
    %c0_i32 = arith.constant 0 : i32
    %c0_i32_0 = arith.constant 0 : i32
    return %1, %c0_i32 : i32, i32
  }
  func.func @transform_2(%arg0: i32, %arg1: i32) -> (i32, i32) {
    %c0_i32 = arith.constant 0 : i32
    %c0_i32_0 = arith.constant 0 : i32
    return %arg0, %c0_i32 : i32, i32
  }
  func.func @transform_3(%arg0: i32, %arg1: i32) -> (i32, i32) {
    %c0_i32 = arith.constant 0 : i32
    %c0_i32_0 = arith.constant 0 : i32
    return %arg0, %c0_i32 : i32, i32
  }
  func.func @transform_4(%arg0: i32, %arg1: i32) -> (i32, i32) {
    %c0_i32 = arith.constant 0 : i32
    %c0_i32_0 = arith.constant 0 : i32
    return %arg0, %c0_i32 : i32, i32
  }
}

</mosaic_0001>

<bundles_post_ra>
// kernel: combined_loss.1
= control target key start
LH: loop header
LB: loop body
LE: loop exit
PB: predicated region body
PF: predicated region fallthrough
CT: control target
= control target key end

     0   :  { %s540_s15 = smov 0   ;;  %s542_s16 = smov 0   ;;  %s589_s0 = inlined_call_operand.vmem [shape: f32[16,128], index: 0, kind: input, shape index: {}]   ;;  %s590_s1 = inlined_call_operand.vmem [shape: f32[16,128], index: 1, kind: input, shape index: {}]   ;;  %s591_s2 = inlined_call_operand.vmem [shape: f32[16,128], index: 2, kind: output, shape index: {0}]   ;;  %s592_s3 = inlined_call_operand.vmem [shape: f32[16,128], index: 3, kind: output, shape index: {1}]   ;;  %s593_s4 = inlined_call_operand.vmem [shape: f32[16,128], index: 4, kind: output, shape index: {2}]  }
   0x1   :  { %s544_s17 = smov 0  }
   0x2 LB: > { %s27_s18 = sadd.s32 1, %s509_s16  ;;  %p453_p0 = scmp.ge.s32.totalorder %s513_s17, 1  ;;  %s513_s17 = sphi %s544_s17, %s15_s17   ;;  %s509_s16 = sphi %s542_s16, %s595_s16   ;;  %s505_s15 = sphi %s540_s15, %s594_s15  }
   0x3   : > { %p29_p1 = scmp.ge.s32.totalorder %s27_s18, 2  ;;  %p195_p2 = scmp.lt.s32.totalorder %s513_s17, 3 }
   0x5   : > { %s597_s18 = smov (%p29_p1, %s27_s18), 0  ;;  %p196_p3 = pnand %p453_p0, %p195_p2 }
   0x6   : > { %p234_p4 = scmp.lt.s32.totalorder (!%p196_p3), %s505_s15, 1 }
   0x7   : > { %199 = sbr.rel (%p196_p3) target bundleno = 60 (0x3c), region = 28 }
   0xe   : > { %s599_s15 = smov (!%p234_p4, %s505_s15), 1 }
   0xf   : > { %s558_s19 = sshll.u32 %s599_s15, 3 }
  0x10   : > { %s237_s22 = scalar_lea.vmem %s589_s0, %s558_s19  ;;  %s243_s25 = scalar_lea.vmem %s590_s1, %s558_s19 }
  0x11   : > { %v264_v0 = vld [vmem:[%s237_s22] sm:$0xff]  ;;  %s248_s28 = scalar_lea.vmem %s591_s2, %s558_s19  ;;  %s252_s5 = scalar_lea.vmem %s592_s3, %s558_s19 }
  0x12   : > { %v266_v1 = vand.u32 2147483647, %v264_v0  ;;  %v265_v7 = vld [vmem:[%s243_s25] sm:$0xff]  ;;  %v270_v9 = vmax.f32 %v264_v0, 0.0  ;;  %vm288_vm1 = vcmp.ge.f32.partialorder %v264_v0, 0.0  ;;  %s256_s8 = scalar_lea.vmem %s593_s4, %s558_s19 }
  0x13   : > { %v271_v10 = vmul.f32 %v265_v7, %v264_v0 }
  0x14   : > { %v267_v2 = vsub.f32 0.0, %v266_v1 }
  0x15   : > { %v272_v14 = vsub.f32 %v270_v9, %v271_v10 }
  0x16   : > { %v268_v3 = vmul.f32 1.442695, %v267_v2 }
  0x18   : > { %485 = vpow2.f32 %v268_v3 }
  0x22   : > { %v486_v4 = vpop.eup %485 }
  0x23   : > { %v273_v5 = vadd.f32 1.0, %v486_v4  ;;  %v276_v6 = vmul.f32 -0.5, %v486_v4  ;;  %v279_v11 = vand.u32 2147483647, %v486_v4  ;;  %v289_v21 = vsel %vm288_vm1, 1.0, %v486_v4 }
  0x25   : > { %487 = vlog2.f32 %v273_v5  ;;  %v277_v8 = vadd.f32 1.0, %v276_v6  ;;  %vm280_vm0 = vcmp.lt.f32.partialorder %v279_v11, 0.0004427343 }
  0x26   : > { %489 = vrcp.f32 %v273_v5 }
  0x27   : > { %v278_v12 = vmul.f32 %v486_v4, %v277_v8 }
  0x2f   : > { %v488_v13 = vpop.eup %487 }
  0x30   : > { %v490_v15 = vpop.eup %489  ;;  %v275_v16 = vmul.f32 0.6931472, %v488_v13 }
  0x31   : > { %v285_v17 = vmul.f32 %v490_v15, %v273_v5 }
  0x32   : > { %v281_v18 = vsel %vm280_vm0, %v278_v12, %v275_v16 }
  0x33   : > { %v282_v19 = vadd.f32 %v281_v18, %v272_v14  ;;  %v286_v20 = vsub.f32 2.0, %v285_v17 }
  0x35   : > { %309 = vst [vmem:[%s248_s28] sm:$0xff] %v282_v19  ;;  %v287_v22 = vmul.f32 %v490_v15, %v286_v20 }
  0x37   : > { %v290_v23 = vmul.f32 %v289_v21, %v287_v22 }
  0x39   : > { %v296_v24 = vmul.f32 %v290_v23, %v265_v7  ;;  %v301_v25 = vadd.f32 %v290_v23, %v265_v7 }
  0x3b   : > { %311 = vst [vmem:[%s252_s5] sm:$0xff] %v296_v24  ;;  %313 = vst [vmem:[%s256_s8] sm:$0xff] %v301_v25 }
  0x3c PF: > { %s15_s17 = sadd.s32 1, %s513_s17   ;;  %s594_s15 = smov %s509_s16 }
  0x3d   : > { %p12_p5 = scmp.ge.s32.totalorder %s15_s17, 4   ;;  %s595_s16 = smov %s597_s18 }
  0x3f   :  { %14 = sbr.rel (!%p12_p5) target bundleno = 2 (0x2), region = 93 }

</bundles_post_ra>
